<compile_context>
chip_gen: v5e
topology: v5e:2x2
jax: 0.10.0
libtpu: 0.0.40
codegen_flags: <defaults>
</compile_context>

<pallas_src>
import jax
import jax.numpy as jnp
from jax.experimental import pallas as pl
from jax.experimental.pallas import tpu as pltpu

_LANE = 128
_SUBLANE = 8


def _round_up(x, m):
    return (x + m - 1) // m * m


def simplenet_kernel(x_ref, w1_ref, b1_ref, w2_ref, b2_ref, o_ref):
    # In-kernel cast of the raw f32 x tile to bf16 (VPU; avoids a separate
    # wrapper-side pad/convert HBM pass over x).
    x = x_ref[...].astype(jnp.bfloat16)
    # Hidden layer: bf16 matmul on the MXU, f32 accumulation.
    h = jnp.dot(x, w1_ref[...], preferred_element_type=jnp.float32)
    # Bias add + ReLU in f32 (b1 is (1, HID) -> broadcasts over the batch tile).
    h = jnp.maximum(h + b1_ref[...], 0.0)
    # Output layer: cast the activation to bf16 for the second MXU pass.
    y = jnp.dot(h.astype(jnp.bfloat16), w2_ref[...],
                preferred_element_type=jnp.float32)
    o_ref[...] = (y + b2_ref[...]).astype(o_ref.dtype)


def simplenet_forward(x, w1, b1, w2, b2, *, tile_batch=2048):
    """x: (B, IN); w1: (IN, HID); b1: (HID,); w2: (HID, OUT); b2: (OUT,).

    Weights are stored as PyTorch `weight.T`, so the kernel computes
    y = relu(x @ W1 + b1) @ W2 + b2 directly.
    """
    B, IN = x.shape
    HID = w1.shape[1]
    OUT = w2.shape[1]
    out_dtype = x.dtype
    in_item = jnp.dtype(x.dtype).itemsize
    out_item = jnp.dtype(out_dtype).itemsize

    # --- Batch tiling -------------------------------------------------------
    # At least 2 grid steps when B allows (v7x has 2 TensorCores; harmless on
    # single-TC v5e/v6e).  Tile = cdiv(B, tiles) rounded up to the 8-row
    # sublane, so the final (masked) tile pads by at most 7 rows.
    want_tiles = max(pl.cdiv(B, tile_batch), 2 if B >= 2 * _SUBLANE else 1)
    TB = _round_up(pl.cdiv(B, want_tiles), _SUBLANE)

    # --- VMEM budget: shrink TB rather than under-clamp the limit -----------
    def vmem_need(tb):
        x_tile = 2 * tb * IN * in_item                   # double-buffered x tile
        o_tile = 2 * tb * OUT * out_item                 # double-buffered out tile
        weights = 2 * (IN * HID * 2 + HID * OUT * 2 + HID * 4 + OUT * 4)
        hidden = tb * _round_up(HID, _LANE) * 4          # f32 intermediate
        return x_tile + o_tile + weights + hidden

    try:
        vmem_cap = pltpu.get_tpu_info().vmem_capacity_bytes
    except Exception:
        vmem_cap = 64 * 1024 * 1024                      # v7x-safe fallback
    budget = min((vmem_cap * 3) // 4, 100 * 1024 * 1024)
    while TB > _SUBLANE and 2 * vmem_need(TB) > budget:
        TB = _round_up(TB // 2, _SUBLANE)
    num_tiles = pl.cdiv(B, TB)
    vmem_limit = int(min(max(2 * vmem_need(TB), 16 * 1024 * 1024), budget))

    # Weights / biases: tiny and VMEM-resident across all grid steps (constant
    # index_maps); bf16 matmul operands, f32 biases for the epilogue.
    # (Default double-buffering of these residents costs only a few KiB here,
    #  so pl.Buffered(1) is intentionally not used.)
    w1_c = w1.astype(jnp.bfloat16)
    w2_c = w2.astype(jnp.bfloat16)
    b1_c = b1.astype(jnp.float32).reshape(1, HID)
    b2_c = b2.astype(jnp.float32).reshape(1, OUT)

    # Scheduler hint for XLA around the custom call.
    flops = 2 * B * (IN * HID + HID * OUT)
    bytes_accessed = (x.size * in_item + w1_c.size * 2 + w2_c.size * 2
                      + b1_c.size * 4 + b2_c.size * 4 + B * OUT * out_item)
    cost = pl.CostEstimate(flops=flops, transcendentals=0,
                           bytes_accessed=bytes_accessed)

    return pl.pallas_call(
        simplenet_kernel,
        out_shape=jax.ShapeDtypeStruct((B, OUT), out_dtype),
        grid_spec=pl.GridSpec(
            grid=(num_tiles,),
            in_specs=[
                # x tile marches along the batch; its last block dim equals the
                # full array dim, so no lane padding / wrapper pass is needed.
                pl.BlockSpec((TB, IN), lambda i: (i, 0)),
                # Weights/biases: constant block index -> stay VMEM-resident.
                pl.BlockSpec((IN, HID), lambda i: (0, 0)),
                pl.BlockSpec((1, HID), lambda i: (0, 0)),
                pl.BlockSpec((HID, OUT), lambda i: (0, 0)),
                pl.BlockSpec((1, OUT), lambda i: (0, 0)),
            ],
            # Output written at its true (B, OUT) shape: no 8x lane-padding
            # write amplification and no extra un-pad slice pass.  Rows past B
            # in the last tile are masked on write by Pallas.
            out_specs=pl.BlockSpec((TB, OUT), lambda i: (i, 0)),
        ),
        compiler_params=pltpu.CompilerParams(
            dimension_semantics=("parallel",),
            vmem_limit_bytes=vmem_limit,
        ),
        cost_estimate=cost,
    )(x, w1_c, b1_c, w2_c, b2_c)


def init_params(key, num_in, num_hid, num_out, dtype=jnp.float32):
    # Deterministic init mimicking nn.Linear's uniform(-1/sqrt(fan_in), ...).
    k1, k2, k3, k4 = jax.random.split(key, 4)
    lim1 = 1.0 / jnp.sqrt(num_in)
    lim2 = 1.0 / jnp.sqrt(num_hid)
    w1 = jax.random.uniform(k1, (num_in, num_hid), dtype, -lim1, lim1)
    b1 = jax.random.uniform(k2, (num_hid,), dtype, -lim1, lim1)
    w2 = jax.random.uniform(k3, (num_hid, num_out), dtype, -lim2, lim2)
    b2 = jax.random.uniform(k4, (num_out,), dtype, -lim2, lim2)
    return w1, b1, w2, b2


if __name__ == "__main__":
    num_in_feat, num_hid_feat, num_out_feat = 32, 64, 16
    batch = 8

    key = jax.random.PRNGKey(0)
    kx, kp = jax.random.split(key)
    x = jax.random.normal(kx, (batch, num_in_feat), jnp.float32)
    w1, b1, w2, b2 = init_params(kp, num_in_feat, num_hid_feat, num_out_feat)

    out = simplenet_forward(x, w1, b1, w2, b2)
    out = jax.block_until_ready(out)
    assert out.shape == (batch, num_out_feat)
    assert out.dtype == x.dtype

    # Reference matching the kernel's numerics (bf16 matmul operands, f32
    # accumulation, f32 bias/ReLU epilogue).
    xb = x.astype(jnp.bfloat16).astype(jnp.float32)
    w1b = w1.astype(jnp.bfloat16).astype(jnp.float32)
    w2b = w2.astype(jnp.bfloat16).astype(jnp.float32)
    h_ref = jnp.maximum(xb @ w1b + b1, 0.0)
    ref_bf16 = h_ref.astype(jnp.bfloat16).astype(jnp.float32) @ w2b + b2
    assert jnp.allclose(out, ref_bf16, atol=2e-2, rtol=2e-2)

    # Sanity vs. the pure-f32 PyTorch-equivalent forward (looser tolerance
    # because matmul operands are bf16).
    ref_f32 = jnp.maximum(x @ w1 + b1, 0.0) @ w2 + b2
    assert jnp.allclose(out, ref_f32, atol=1e-1, rtol=1e-1)

    print("KERNEL_OK")
</pallas_src>

<mosaic_0001>
module attributes {stable_mosaic.version = 11 : i64} {
  func.func @simplenet_kernel(%arg0: i32, %arg1: memref<8x32xf32, #tpu.memory_space<vmem>>, %arg2: memref<32x64xbf16, #tpu.memory_space<vmem>>, %arg3: memref<1x64xf32, #tpu.memory_space<vmem>>, %arg4: memref<64x16xbf16, #tpu.memory_space<vmem>>, %arg5: memref<1x16xf32, #tpu.memory_space<vmem>>, %arg6: memref<8x16xf32, #tpu.memory_space<vmem>>) attributes {dimension_semantics = [#tpu.dimension_semantics<parallel>], iteration_bounds = array<i64: 1>, scalar_prefetch = 0 : i64, scratch_operands = 0 : i64, tpu.core_type = #tpu.core_type<tc>, window_params = [{transform_indices = @transform_0, window_bounds = array<i64: 8, 32>}, {pipeline_mode = #tpu.pipeline_mode<synchronous>, transform_indices = @transform_1, window_bounds = array<i64: 32, 64>}, {pipeline_mode = #tpu.pipeline_mode<synchronous>, transform_indices = @transform_2, window_bounds = array<i64: 1, 64>}, {pipeline_mode = #tpu.pipeline_mode<synchronous>, transform_indices = @transform_3, window_bounds = array<i64: 64, 16>}, {pipeline_mode = #tpu.pipeline_mode<synchronous>, transform_indices = @transform_4, window_bounds = array<i64: 1, 16>}, {transform_indices = @transform_5, window_bounds = array<i64: 8, 16>}]} {
    %c0 = arith.constant 0 : index
    %c0_0 = arith.constant 0 : index
    %0 = vector.load %arg1[%c0, %c0_0] : memref<8x32xf32, #tpu.memory_space<vmem>>, vector<8x32xf32>
    %1 = arith.truncf %0 : vector<8x32xf32> to vector<8x32xbf16>
    %c0_1 = arith.constant 0 : index
    %c0_2 = arith.constant 0 : index
    %2 = vector.load %arg2[%c0_1, %c0_2] : memref<32x64xbf16, #tpu.memory_space<vmem>>, vector<32x64xbf16>
    %cst = arith.constant dense<0.000000e+00> : vector<8x64xf32>
    %3 = tpu.matmul %1, %2, %cst {dimension_numbers = #tpu.dot_dimension_numbers<[1], [0], [0], [1], [0, 0, 1, 1], [], []>} : vector<8x32xbf16>, vector<32x64xbf16>, vector<8x64xf32> -> vector<8x64xf32>
    %c0_3 = arith.constant 0 : index
    %c0_4 = arith.constant 0 : index
    %4 = vector.load %arg3[%c0_3, %c0_4] : memref<1x64xf32, #tpu.memory_space<vmem>>, vector<1x64xf32>
    %5 = vector.broadcast %4 : vector<1x64xf32> to vector<8x64xf32>
    %6 = arith.addf %3, %5 : vector<8x64xf32>
    %cst_5 = arith.constant 0.000000e+00 : f32
    %7 = vector.broadcast %cst_5 : f32 to vector<8x64xf32>
    %8 = arith.maximumf %6, %7 : vector<8x64xf32>
    %9 = arith.truncf %8 : vector<8x64xf32> to vector<8x64xbf16>
    %c0_6 = arith.constant 0 : index
    %c0_7 = arith.constant 0 : index
    %10 = vector.load %arg4[%c0_6, %c0_7] : memref<64x16xbf16, #tpu.memory_space<vmem>>, vector<64x16xbf16>
    %cst_8 = arith.constant dense<0.000000e+00> : vector<8x16xf32>
    %11 = tpu.matmul %9, %10, %cst_8 {dimension_numbers = #tpu.dot_dimension_numbers<[1], [0], [0], [1], [0, 0, 1, 1], [], []>} : vector<8x64xbf16>, vector<64x16xbf16>, vector<8x16xf32> -> vector<8x16xf32>
    %c0_9 = arith.constant 0 : index
    %c0_10 = arith.constant 0 : index
    %12 = vector.load %arg5[%c0_9, %c0_10] : memref<1x16xf32, #tpu.memory_space<vmem>>, vector<1x16xf32>
    %13 = vector.broadcast %12 : vector<1x16xf32> to vector<8x16xf32>
    %14 = arith.addf %11, %13 : vector<8x16xf32>
    %c0_11 = arith.constant 0 : index
    %c0_12 = arith.constant 0 : index
    %15 = vector.load %arg6[%c0_11, %c0_12] : memref<8x16xf32, #tpu.memory_space<vmem>>, vector<8x16xf32>
    tpu.vector_store %arg6[%c0_11, %c0_12], %14 {strides = array<i32>} : memref<8x16xf32, #tpu.memory_space<vmem>>, vector<8x16xf32>,
    return
  }
  func.func @transform_0(%arg0: i32) -> (i32, i32) {
    %c0_i32 = arith.constant 0 : i32
    %c0_i32_0 = arith.constant 0 : i32
    return %arg0, %c0_i32 : i32, i32
  }
  func.func @transform_1(%arg0: i32) -> (i32, i32) {
    %c0_i32 = arith.constant 0 : i32
    %c0_i32_0 = arith.constant 0 : i32
    %c0_i32_1 = arith.constant 0 : i32
    return %c0_i32, %c0_i32_0 : i32, i32
  }
  func.func @transform_2(%arg0: i32) -> (i32, i32) {
    %c0_i32 = arith.constant 0 : i32
    %c0_i32_0 = arith.constant 0 : i32
    %c0_i32_1 = arith.constant 0 : i32
    return %c0_i32, %c0_i32_0 : i32, i32
  }
  func.func @transform_3(%arg0: i32) -> (i32, i32) {
    %c0_i32 = arith.constant 0 : i32
    %c0_i32_0 = arith.constant 0 : i32
    %c0_i32_1 = arith.constant 0 : i32
    return %c0_i32, %c0_i32_0 : i32, i32
  }
  func.func @transform_4(%arg0: i32) -> (i32, i32) {
    %c0_i32 = arith.constant 0 : i32
    %c0_i32_0 = arith.constant 0 : i32
    %c0_i32_1 = arith.constant 0 : i32
    return %c0_i32, %c0_i32_0 : i32, i32
  }
  func.func @transform_5(%arg0: i32) -> (i32, i32) {
    %c0_i32 = arith.constant 0 : i32
    %c0_i32_0 = arith.constant 0 : i32
    return %arg0, %c0_i32 : i32, i32
  }
}

</mosaic_0001>

<bundles_post_ra>
// kernel: tpu_custom_call.1
= control target key start
LH: loop header
LB: loop body
LE: loop exit
PB: predicated region body
PF: predicated region fallthrough
CT: control target
= control target key end

     0   :  { %s256_s0 = inlined_call_operand.vmem [shape: f32[8,32], index: 0, kind: input, shape index: {}]   ;;  %s257_s1 = inlined_call_operand.vmem [shape: bf16[32,64], index: 1, kind: input, shape index: {}]   ;;  %s258_s2 = inlined_call_operand.vmem [shape: f32[1,64], index: 2, kind: input, shape index: {}]   ;;  %s259_s3 = inlined_call_operand.vmem [shape: bf16[64,16], index: 3, kind: input, shape index: {}]   ;;  %s260_s4 = inlined_call_operand.vmem [shape: f32[1,16], index: 4, kind: input, shape index: {}]   ;;  %s261_s5 = inlined_call_operand.hbm [shape: f32[8,16], index: 5, kind: output, shape index: {}]  }
   0x1   :  { %v161_v0 = vld [vmem:[%s257_s1 + $0x8] sm:$0xff]  ;;  %v160_v1 = vld [vmem:[%s257_s1] sm:$0xff]  ;;  %v165_v2 = vld [vmem:[%s259_s3 + $0x18] sm:$0xff] }
   0x2   :  { %54 = vmatpush.bf16.msra.mxu0 %v161_v0  ;;  %v22_v3 = vld [vmem:[%s256_s0] sm:$0xff] }
   0x3   :  { %10 = vsyncpa [#allocation3], 0  ;;  %107 = vmatpush.bf16.msra.mxu1 %v165_v2  ;;  %v164_v4 = vld [vmem:[%s259_s3 + $0x10] sm:$0xff]  ;;  %v23_v5 = vpack.c.bf16 %v22_v3, %v22_v3  ;;  %vm44_vm0 = vcmask 261120   ;;  %v163_v6 = vld [vmem:[%s259_s3 + $0x8] sm:$0xff]  ;;  %vm99_vm1 = vcmask 523264  }
   0x4   :  { %v162_v7 = vld [vmem:[%s259_s3] sm:$0xff]  ;;  %s195_s9 = smov [#allocation2]   ;;  %s125_s12 = sshll.u32 %s261_s5, 4  ;;  %vm116_vm2 = vcmask 130048   ;;  %s126_s12 = int_to_ptr.hbm [resolvable:$true] %s125_s12 }
   0x5   :  { %v167_v8 = vld [vmem:[%s258_s2] ss:$0 sm:$0xff]  ;;  %s123_s10 = sshll.u32 %s195_s9, 4  ;;  %s124_s10 = int_to_ptr.vmem [resolvable:$true] %s123_s10 }
   0x6   :  { %55 = vmatpush.bf16.msra.mxu0 %v160_v1  ;;  %v168_v14 = vld [vmem:[%s260_s4] ss:$0 sm:$0xff] }
   0x7   :  { %108 = vmatpush.bf16.msra.mxu1 %v164_v4 }
   0x9   :  { %142 = vmatmul.msk.bf16.vlgmr.msra.gmra.mxu0 %vm44_vm0, %v23_v5 }
   0xb   :  { %109 = vmatpush.bf16.msra.mxu1 %v163_v6 }
   0xf   :  { %110 = vmatpush.bf16.msra.mxu1 %v162_v7 }
  0x86   :  { %v57_v9 = vpop.f32.mrf.mxu0 }
  0x87   :  { %v58_v10 = vadd.f32 %v167_v8, %v57_v9 }
  0x89   :  { %v61_v11 = vmax.f32 %v58_v10, 0.0 }
  0x8b   :  { %v62_v12 = vpack.c.bf16 %v61_v11, %v61_v11 }
  0x8d   :  { %159 = vmatmul.msk.bf16.vlgmr.msra.gmra.mxu1 %vm99_vm1, %v62_v12 }
  0x8e   :  { %v59_v13 = vpop.f32.mrf.mxu0 }
 0x10a   :  { %v112_v15 = vpop.f32.mrf.mxu1 }
 0x10b   :  { %v113_v16 = vadd.f32 %v168_v14, %v112_v15 }
 0x10d   :  { %117 = vst.msk [vmem:[#allocation2] sm:$0xff] %vm116_vm2, %v113_v16 }
 0x10e   :  { %128 = dma.vmem_to_hbm [thread:$0]  %s124_s10, 128, %s126_s12, [#allocation3]  }
 0x112   :  { %v114_v17 = vpop.f32.mrf.mxu1 }
 0x113   :  { %193 = dma.done.wait [#allocation3], 128  }
 0x114   :  { %194 = vsyncadd [#allocation3], 4294967168 }
 0x115   :  { %133 = vsyncpa [#allocation3], 1 }

</bundles_post_ra>
